<compile_context>
chip_gen: v5e
topology: v5e:2x2
jax: 0.10.0
libtpu: 0.0.40
codegen_flags: <defaults>
</compile_context>

<pallas_src>
import jax
import jax.numpy as jnp
from jax.experimental import pallas as pl
from jax.experimental.pallas import tpu as pltpu


def _round_up(x, m):
    return ((x + m - 1) // m) * m


def _cdiv(a, b):
    return (a + b - 1) // b


def _make_fused_kernel(c_in, couts, nb, tm, chunk):
    """Build the fused multi-step kernel (fully static unroll)."""
    S = len(couts)
    c_out_total = sum(couts)
    max_cin = c_in + sum(couts[:-1])          # cin of the last step
    bias_col = max_cin                        # bias lives in the last column

    # Row offset of step s inside the packed weight operand.
    roffs = []
    acc = 0
    for c in couts:
        roffs.append(acc)
        acc += c
    # Column offset of y_j inside every step's weight (x occupies cols [0, c_in)).
    ycoffs = []
    acc = c_in
    for c in couts:
        ycoffs.append(acc)
        acc += c
    # Output channel offset of y_s in the REVERSED concat.
    out_offs = [sum(couts[s + 1:]) for s in range(S)]

    def kernel(x_ref, w_ref, o_ref):
        # Hoist the tiny weight / bias slices out of the batch & chunk loops.
        w_x, w_y, bias = [], [], []
        for s in range(S):
            r0, co = roffs[s], couts[s]
            w_x.append(w_ref[r0:r0 + co, 0:c_in])
            w_y.append([w_ref[r0:r0 + co, ycoffs[j]:ycoffs[j] + couts[j]]
                        for j in range(s)])
            bias.append(w_ref[r0:r0 + co, bias_col:bias_col + 1])

        for b in range(nb):                           # static batch unroll
            for off in range(0, tm, chunk):           # static lane-chunk unroll
                cs = min(chunk, tm - off)
                x = x_ref[b, :, off:off + cs]         # (c_in, cs)
                ys = []
                for s in range(S):
                    acc_v = jnp.dot(w_x[s], x,
                                    preferred_element_type=jnp.float32)
                    for j in range(s):
                        acc_v += jnp.dot(w_y[s][j], ys[j],
                                         preferred_element_type=jnp.float32)
                    y = jnp.maximum(acc_v + bias[s], 0.0)   # (cout_s, cs), f32
                    ys.append(y)
                    o0 = out_offs[s]
                    # Direct, lane-dense store into the reversed-concat slice.
                    o_ref[b, o0:o0 + couts[s], off:off + cs] = \
                        y.astype(o_ref.dtype)

    return kernel


def simple_multi_step_generator(x_nchw, step_params, *, max_tile_spatial=8192,
                                lane_chunk=512, target_cell_bytes=256 * 1024):
    """x_nchw: (N, C, H, W); step_params: list of (w:(Cout,Cin), b:(Cout,)).

    Returns (N, sum(Cout), H, W): channel-concat of step outputs, reversed.
    """
    N, C, H, W = x_nchw.shape
    HW = H * W
    S = len(step_params)
    assert S >= 1
    couts = tuple(int(w.shape[0]) for (w, _) in step_params)
    c_out_total = sum(couts)
    max_cin = C + sum(couts[:-1])

    # Sanity-check weight shapes against the growing-concat semantics.
    cin = C
    for (w, b) in step_params:
        assert w.shape == (w.shape[0], cin), (w.shape, cin)
        assert b.shape == (w.shape[0],), b.shape
        cin += w.shape[0]

    # ---- spatial (lane) tile: multiple of 128, as large as reasonable ----
    if HW <= 128:
        tm = HW                                   # equal-to-full-dim block
    else:
        tm = min(_round_up(max_tile_spatial, 128), _round_up(HW, 128))
    n_sp = _cdiv(HW, tm)

    # v7x megacore: keep >=2 parallel grid cells when the input allows it.
    if N * n_sp < 2 and HW > 128 and tm > 128:
        tm = max(128, _round_up(_cdiv(HW, 2), 128))
        n_sp = _cdiv(HW, tm)

    # ---- batch blocking when spatial fits in a single small tile ----
    bytes_per_image = 4 * tm * (C + c_out_total)
    nb = 1
    if n_sp == 1 and bytes_per_image < target_cell_bytes and N > 1:
        nb = max(1, min(N, target_cell_bytes // max(bytes_per_image, 1)))
        if N * n_sp >= 2:                         # don't collapse below 2 cells
            nb = min(nb, max(1, N // 2))
    n_b = _cdiv(N, nb)

    chunk = min(lane_chunk, tm)                   # in-register lane chunk

    # ---- pack all weights + biases into ONE small VMEM operand ----
    # Layout: rows = concatenated step outputs; cols [0, cin_s) = step weight
    # (x block first, then y_0, y_1, ...); last column = bias.
    wpack = jnp.zeros((c_out_total, max_cin + 1), jnp.float32)
    roff = 0
    for (w, b) in step_params:
        co, ci = w.shape
        wpack = wpack.at[roff:roff + co, :ci].set(w.astype(jnp.float32))
        wpack = wpack.at[roff:roff + co, max_cin].set(b.astype(jnp.float32))
        roff += co

    x3 = x_nchw.reshape(N, C, HW)                 # free reshape — no pad/copy

    kernel = _make_fused_kernel(C, couts, nb, tm, chunk)

    # Advisory cost estimate (memory-bound).
    m_total = N * HW
    flops = 0
    cin = C
    for co in couts:
        flops += 2 * co * cin * m_total
        cin += co
    itemsize = jnp.dtype(x_nchw.dtype).itemsize
    bytes_accessed = itemsize * m_total * (C + c_out_total) + 4 * wpack.size

    out3 = pl.pallas_call(
        kernel,
        out_shape=jax.ShapeDtypeStruct((N, c_out_total, HW), x_nchw.dtype),
        grid_spec=pltpu.PrefetchScalarGridSpec(
            num_scalar_prefetch=0,
            grid=(n_b, n_sp),
            in_specs=[
                pl.BlockSpec((nb, C, tm), lambda b, s: (b, 0, s)),
                pl.BlockSpec((c_out_total, max_cin + 1), lambda b, s: (0, 0)),
            ],
            out_specs=pl.BlockSpec((nb, c_out_total, tm),
                                   lambda b, s: (b, 0, s)),
        ),
        compiler_params=pltpu.CompilerParams(
            dimension_semantics=("parallel", "parallel")),
        cost_estimate=pl.CostEstimate(
            flops=int(flops), transcendentals=0,
            bytes_accessed=int(bytes_accessed)),
    )(x3, wpack)

    return out3.reshape(N, c_out_total, H, W)


def make_step_params(key, in_ch, out_ch):
    kw, kb = jax.random.split(key)
    # Conv2d-style weight layout (out_ch, in_ch), roughly Kaiming-scaled.
    w = jax.random.normal(kw, (out_ch, in_ch), jnp.float32) * (1.0 / jnp.sqrt(in_ch))
    b = jax.random.normal(kb, (out_ch,), jnp.float32) * 0.01
    return w, b


def reference_forward(x_nchw, step_params):
    """Pure-jnp reference with identical semantics (sanity check)."""
    cur_in = x_nchw
    outs = []
    for (w, b) in step_params:
        y = jnp.einsum("nchw,oc->nohw", cur_in, w) + b[None, :, None, None]
        y = jnp.maximum(y, 0.0)
        outs.append(y)
        cur_in = jnp.concatenate((cur_in, y), axis=1)
    return jnp.concatenate(outs[::-1], axis=1)


if __name__ == "__main__":
    key = jax.random.PRNGKey(0)
    k_x, k_p = jax.random.split(key)

    # Small shapes: batch=2, channels=4, spatial=16x16, 3 steps of 4 channels.
    N, C, H, W = 2, 4, 16, 16
    num_steps, out_ch = 3, 4

    x = jax.random.normal(k_x, (N, C, H, W), jnp.float32)

    step_params = []
    in_ch = C
    pkeys = jax.random.split(k_p, num_steps)
    for s in range(num_steps):
        step_params.append(make_step_params(pkeys[s], in_ch, out_ch))
        in_ch += out_ch

    fwd = jax.jit(simple_multi_step_generator)
    out = jax.block_until_ready(fwd(x, step_params))

    ref = jax.block_until_ready(reference_forward(x, step_params))
    assert out.shape == (N, num_steps * out_ch, H, W), out.shape
    assert jnp.allclose(out, ref, atol=1e-4, rtol=1e-4), "mismatch vs reference"

    print("KERNEL_OK")
</pallas_src>

<mosaic_0001>
module attributes {stable_mosaic.version = 11 : i64} {
  func.func @kernel(%arg0: i32, %arg1: i32, %arg2: memref<1x4x256xf32, #tpu.memory_space<vmem>>, %arg3: memref<12x13xf32, #tpu.memory_space<vmem>>, %arg4: memref<1x12x256xf32, #tpu.memory_space<vmem>>) attributes {dimension_semantics = [#tpu.dimension_semantics<parallel>, #tpu.dimension_semantics<parallel>], iteration_bounds = array<i64: 2, 1>, scalar_prefetch = 0 : i64, scratch_operands = 0 : i64, tpu.core_type = #tpu.core_type<tc>, window_params = [{transform_indices = @transform_0, window_bounds = array<i64: 1, 4, 256>}, {pipeline_mode = #tpu.pipeline_mode<synchronous>, transform_indices = @transform_1, window_bounds = array<i64: 12, 13>}, {transform_indices = @transform_2, window_bounds = array<i64: 1, 12, 256>}]} {
    %c0 = arith.constant 0 : index
    %c0_0 = arith.constant 0 : index
    %0 = vector.load %arg3[%c0, %c0_0] : memref<12x13xf32, #tpu.memory_space<vmem>>, vector<4x4xf32>
    %c0_1 = arith.constant 0 : index
    %c12 = arith.constant 12 : index
    %1 = vector.load %arg3[%c0_1, %c12] : memref<12x13xf32, #tpu.memory_space<vmem>>, vector<4x1xf32>
    %c4 = arith.constant 4 : index
    %c0_2 = arith.constant 0 : index
    %2 = vector.load %arg3[%c4, %c0_2] : memref<12x13xf32, #tpu.memory_space<vmem>>, vector<4x4xf32>
    %c4_3 = arith.constant 4 : index
    %c4_4 = arith.constant 4 : index
    %3 = vector.load %arg3[%c4_3, %c4_4] : memref<12x13xf32, #tpu.memory_space<vmem>>, vector<4x4xf32>
    %c4_5 = arith.constant 4 : index
    %c12_6 = arith.constant 12 : index
    %4 = vector.load %arg3[%c4_5, %c12_6] : memref<12x13xf32, #tpu.memory_space<vmem>>, vector<4x1xf32>
    %c8 = arith.constant 8 : index
    %c0_7 = arith.constant 0 : index
    %5 = vector.load %arg3[%c8, %c0_7] : memref<12x13xf32, #tpu.memory_space<vmem>>, vector<4x4xf32>
    %c8_8 = arith.constant 8 : index
    %c4_9 = arith.constant 4 : index
    %6 = vector.load %arg3[%c8_8, %c4_9] : memref<12x13xf32, #tpu.memory_space<vmem>>, vector<4x4xf32>
    %c8_10 = arith.constant 8 : index
    %c8_11 = arith.constant 8 : index
    %7 = vector.load %arg3[%c8_10, %c8_11] : memref<12x13xf32, #tpu.memory_space<vmem>>, vector<4x4xf32>
    %c8_12 = arith.constant 8 : index
    %c12_13 = arith.constant 12 : index
    %8 = vector.load %arg3[%c8_12, %c12_13] : memref<12x13xf32, #tpu.memory_space<vmem>>, vector<4x1xf32>
    %c0_14 = arith.constant 0 : index
    %c0_15 = arith.constant 0 : index
    %c0_16 = arith.constant 0 : index
    %9 = vector.load %arg2[%c0_14, %c0_15, %c0_16] : memref<1x4x256xf32, #tpu.memory_space<vmem>>, vector<1x4x256xf32>
    %10 = vector.shape_cast %9 : vector<1x4x256xf32> to vector<4x256xf32>
    %cst = arith.constant dense<0.000000e+00> : vector<4x256xf32>
    %11 = tpu.matmul %0, %10, %cst {dimension_numbers = #tpu.dot_dimension_numbers<[1], [0], [0], [1], [0, 0, 1, 1], [], []>} : vector<4x4xf32>, vector<4x256xf32>, vector<4x256xf32> -> vector<4x256xf32>
    %12 = vector.broadcast %1 : vector<4x1xf32> to vector<4x256xf32>
    %13 = arith.addf %11, %12 : vector<4x256xf32>
    %cst_17 = arith.constant 0.000000e+00 : f32
    %14 = vector.broadcast %cst_17 : f32 to vector<4x256xf32>
    %15 = arith.maximumf %13, %14 : vector<4x256xf32>
    %c0_18 = arith.constant 0 : index
    %c8_19 = arith.constant 8 : index
    %c0_20 = arith.constant 0 : index
    %16 = vector.load %arg4[%c0_18, %c8_19, %c0_20] : memref<1x12x256xf32, #tpu.memory_space<vmem>>, vector<1x4x256xf32>
    %17 = vector.shape_cast %16 : vector<1x4x256xf32> to vector<4x256xf32>
    %18 = vector.shape_cast %15 : vector<4x256xf32> to vector<1x4x256xf32>
    tpu.vector_store %arg4[%c0_18, %c8_19, %c0_20], %18 {strides = array<i32>} : memref<1x12x256xf32, #tpu.memory_space<vmem>>, vector<1x4x256xf32>,
    %cst_21 = arith.constant dense<0.000000e+00> : vector<4x256xf32>
    %19 = tpu.matmul %2, %10, %cst_21 {dimension_numbers = #tpu.dot_dimension_numbers<[1], [0], [0], [1], [0, 0, 1, 1], [], []>} : vector<4x4xf32>, vector<4x256xf32>, vector<4x256xf32> -> vector<4x256xf32>
    %cst_22 = arith.constant dense<0.000000e+00> : vector<4x256xf32>
    %20 = tpu.matmul %3, %15, %cst_22 {dimension_numbers = #tpu.dot_dimension_numbers<[1], [0], [0], [1], [0, 0, 1, 1], [], []>} : vector<4x4xf32>, vector<4x256xf32>, vector<4x256xf32> -> vector<4x256xf32>
    %21 = arith.addf %19, %20 : vector<4x256xf32>
    %22 = vector.broadcast %4 : vector<4x1xf32> to vector<4x256xf32>
    %23 = arith.addf %21, %22 : vector<4x256xf32>
    %cst_23 = arith.constant 0.000000e+00 : f32
    %24 = vector.broadcast %cst_23 : f32 to vector<4x256xf32>
    %25 = arith.maximumf %23, %24 : vector<4x256xf32>
    %c0_24 = arith.constant 0 : index
    %c4_25 = arith.constant 4 : index
    %c0_26 = arith.constant 0 : index
    %26 = vector.load %arg4[%c0_24, %c4_25, %c0_26] : memref<1x12x256xf32, #tpu.memory_space<vmem>>, vector<1x4x256xf32>
    %27 = vector.shape_cast %26 : vector<1x4x256xf32> to vector<4x256xf32>
    %28 = vector.shape_cast %25 : vector<4x256xf32> to vector<1x4x256xf32>
    tpu.vector_store %arg4[%c0_24, %c4_25, %c0_26], %28 {strides = array<i32>} : memref<1x12x256xf32, #tpu.memory_space<vmem>>, vector<1x4x256xf32>,
    %cst_27 = arith.constant dense<0.000000e+00> : vector<4x256xf32>
    %29 = tpu.matmul %5, %10, %cst_27 {dimension_numbers = #tpu.dot_dimension_numbers<[1], [0], [0], [1], [0, 0, 1, 1], [], []>} : vector<4x4xf32>, vector<4x256xf32>, vector<4x256xf32> -> vector<4x256xf32>
    %cst_28 = arith.constant dense<0.000000e+00> : vector<4x256xf32>
    %30 = tpu.matmul %6, %15, %cst_28 {dimension_numbers = #tpu.dot_dimension_numbers<[1], [0], [0], [1], [0, 0, 1, 1], [], []>} : vector<4x4xf32>, vector<4x256xf32>, vector<4x256xf32> -> vector<4x256xf32>
    %31 = arith.addf %29, %30 : vector<4x256xf32>
    %cst_29 = arith.constant dense<0.000000e+00> : vector<4x256xf32>
    %32 = tpu.matmul %7, %25, %cst_29 {dimension_numbers = #tpu.dot_dimension_numbers<[1], [0], [0], [1], [0, 0, 1, 1], [], []>} : vector<4x4xf32>, vector<4x256xf32>, vector<4x256xf32> -> vector<4x256xf32>
    %33 = arith.addf %31, %32 : vector<4x256xf32>
    %34 = vector.broadcast %8 : vector<4x1xf32> to vector<4x256xf32>
    %35 = arith.addf %33, %34 : vector<4x256xf32>
    %cst_30 = arith.constant 0.000000e+00 : f32
    %36 = vector.broadcast %cst_30 : f32 to vector<4x256xf32>
    %37 = arith.maximumf %35, %36 : vector<4x256xf32>
    %c0_31 = arith.constant 0 : index
    %c0_32 = arith.constant 0 : index
    %c0_33 = arith.constant 0 : index
    %38 = vector.load %arg4[%c0_31, %c0_32, %c0_33] : memref<1x12x256xf32, #tpu.memory_space<vmem>>, vector<1x4x256xf32>
    %39 = vector.shape_cast %38 : vector<1x4x256xf32> to vector<4x256xf32>
    %40 = vector.shape_cast %37 : vector<4x256xf32> to vector<1x4x256xf32>
    tpu.vector_store %arg4[%c0_31, %c0_32, %c0_33], %40 {strides = array<i32>} : memref<1x12x256xf32, #tpu.memory_space<vmem>>, vector<1x4x256xf32>,
    return
  }
  func.func @transform_0(%arg0: i32, %arg1: i32) -> (i32, i32, i32) {
    %c0_i32 = arith.constant 0 : i32
    %c0_i32_0 = arith.constant 0 : i32
    return %arg0, %c0_i32, %arg1 : i32, i32, i32
  }
  func.func @transform_1(%arg0: i32, %arg1: i32) -> (i32, i32) {
    %c0_i32 = arith.constant 0 : i32
    %c0_i32_0 = arith.constant 0 : i32
    %c0_i32_1 = arith.constant 0 : i32
    return %c0_i32, %c0_i32_0 : i32, i32
  }
  func.func @transform_2(%arg0: i32, %arg1: i32) -> (i32, i32, i32) {
    %c0_i32 = arith.constant 0 : i32
    %c0_i32_0 = arith.constant 0 : i32
    return %arg0, %c0_i32, %arg1 : i32, i32, i32
  }
}

</mosaic_0001>

<bundles_post_ra>
// kernel: simple_multi_step_generator.1
= control target key start
LH: loop header
LB: loop body
LE: loop exit
PB: predicated region body
PF: predicated region fallthrough
CT: control target
= control target key end

     0   :  { %s714_s9 = smov 0   ;;  %s716_s10 = smov 0   ;;  %s792_s0 = inlined_call_operand.vmem [shape: f32[2,4,256], index: 0, kind: input, shape index: {}]   ;;  %s793_s1 = inlined_call_operand.vmem [shape: f32[12,13], index: 1, kind: input, shape index: {}]   ;;  %s794_s2 = inlined_call_operand.vmem [shape: f32[2,12,256], index: 2, kind: output, shape index: {}]  }
   0x1   :  { %s718_s11 = smov 0  }
   0x2 LB: > { %s24_s12 = sadd.s32 1, %s690_s10  ;;  %p609_p0 = scmp.ge.s32.totalorder %s694_s11, 1  ;;  %s694_s11 = sphi %s718_s11, %s12_s11   ;;  %s690_s10 = sphi %s716_s10, %s796_s10   ;;  %s686_s9 = sphi %s714_s9, %s795_s9  }
   0x3   : > { %p26_p1 = scmp.ge.s32.totalorder %s24_s12, 2  ;;  %p133_p2 = scmp.lt.s32.totalorder %s694_s11, 3 }
   0x5   : > { %s798_s12 = smov (%p26_p1, %s24_s12), 0  ;;  %p134_p3 = pnand %p609_p0, %p133_p2 }
   0x6   : > { %p164_p4 = scmp.lt.s32.totalorder (!%p134_p3), %s686_s9, 1  ;;  %s697_s21 = smov (!%p134_p3), 124  }
   0x7   : > { %137 = sbr.rel (%p134_p3) target bundleno = 435 (0x1b3), region = 28  ;;  %s698_s24 = smov (!%p134_p3), 120  }
   0xc   : > { %v183_v0 = vld [vmem:[%s793_s1] sm:$0xf]  ;;  %v696_v1 = vmov 12   ;;  %s800_s9 = smov (!%p164_p4, %s686_s9), 1  ;;  %v184_v3 = vld [vmem:[%s793_s1 + $0x4] sm:$0xf] }
   0xd   : > { %669 = vset.pattern.permute.xlu0 %v696_v1  ;;  %670 = vset.pattern.permute.xlu1 %v696_v1  ;;  %s640_s15 = sshll.u32 %s800_s9, 3  ;;  %vm199_vm0 = vcmask 1043456   ;;  %vm196_vm1 = vcmask 31744   ;;  %v185_v8 = vld [vmem:[%s793_s1 + $0x8] sm:$0xf]  ;;  %s641_s25 = sshll.u32 %s800_s9, 5 }
   0xe   : > { %189 = vperm.xlu0 %669, %v183_v0   ;;  %671 = vset.pattern.permute.xlu2 %v696_v1  ;;  %s171_s18 = scalar_lea.vmem %s792_s0, %s640_s15  ;;  %s759_s28 = scalar_lea.vmem %s794_s2, %s641_s25 }
   0xf   : > { %v186_v2 = vld [vmem:[%s171_s18] sm:$0xff]  ;;  %365 = vrot.lane.b32.xlu1 %v185_v8, %s697_s21  ;;  %458 = vrot.lane.b32.xlu2 %v185_v8, %s698_s24 }
  0x10   : > { %193 = vst [vmem:[#allocation1] ss:$2 sm:$0xff] %v186_v2 }
  0x16   : > { %249 = vrot.lane.b32.xlu0 %v184_v3, %s697_s21 }
  0x17   : > { %v194_v4 = vld.sshfl [vmem:[#allocation1] sm:$0xff pattern:$0x75316420]  ;;  %v195_v5 = vld.sshfl [vmem:[#allocation1 + $0x8] sm:$0xff pattern:$0x75316420]  ;;  %349 = vperm.xlu1 %670, %v184_v3   ;;  %509 = vperm.xlu2 %671, %v185_v8  }
  0x18   : > { %614 = vmatpush.msk.msra.mxu0 %vm199_vm0, %v194_v4  ;;  %616 = vmatpush.msk.msra.mxu1 %vm199_vm0, %v195_v5  ;;  %299 = vst [vmem:[#allocation1] ss:$2 sm:$0xff] %v186_v2 }
  0x19   : > { %615 = vmatmul.msk.f32.vlgmr.msra.gmra.mxu0 %vm196_vm1, %v183_v0  ;;  %617 = vmatmul.msk.f32.vlgmr.msra.gmra.mxu1 %vm196_vm1, %v183_v0 }
  0x1f   : > { %v300_v6 = vld.sshfl [vmem:[#allocation1] sm:$0xff pattern:$0x75316420]  ;;  %v301_v7 = vld.sshfl [vmem:[#allocation1 + $0x8] sm:$0xff pattern:$0x75316420] }
  0x20   : > { %622 = vmatpush.msk.msrb.mxu0 %vm199_vm0, %v300_v6  ;;  %624 = vmatpush.msk.msrb.mxu1 %vm199_vm0, %v301_v7  ;;  %409 = vst [vmem:[#allocation1] ss:$2 sm:$0xff] %v186_v2 }
  0x21   : > { %623 = vmatmul.msk.f32.vlgmr.msrb.gmra.mxu0 %vm196_vm1, %v184_v3  ;;  %625 = vmatmul.msk.f32.vlgmr.msrb.gmra.mxu1 %vm196_vm1, %v184_v3 }
  0x27   : > { %v410_v18 = vld.sshfl [vmem:[#allocation1] sm:$0xff pattern:$0x75316420]  ;;  %v411_v19 = vld.sshfl [vmem:[#allocation1 + $0x8] sm:$0xff pattern:$0x75316420] }
  0x28   : > { %630 = vmatpush.msk.msra.mxu0 %vm199_vm0, %v410_v18  ;;  %632 = vmatpush.msk.msra.mxu1 %vm199_vm0, %v411_v19 }
  0x29   : > { %631 = vmatmul.msk.f32.vlgmr.msra.gmra.mxu0 %vm196_vm1, %v185_v8  ;;  %633 = vmatmul.msk.f32.vlgmr.msra.gmra.mxu1 %vm196_vm1, %v185_v8 }
  0x69   : > { %v459_v31 = vpop.permute.xlu2 %458 }
  0x71   : > { %v510_v40 = vpop.permute.xlu2 %509 }
  0x80   : > { %v190_v9 = vpop.permute.xlu0 %189 }
  0x81   : > { %v366_v17 = vpop.permute.xlu1 %365 }
  0x88   : > { %v250_v16 = vpop.permute.xlu0 %249 }
  0x89   : > { %v350_v22 = vpop.permute.xlu1 %349 }
  0x96   : > { %v221_v10 = vpop.f32.mrf.mxu0  ;;  %v241_v11 = vpop.f32.mrf.mxu1 }
  0x97   : > { %v222_v12 = vadd.f32 %v221_v10, %v190_v9  ;;  %v242_v13 = vadd.f32 %v241_v11, %v190_v9 }
  0x99   : > { %v244_v14 = vmax.f32 %v222_v12, 0.0  ;;  %v245_v15 = vmax.f32 %v242_v13, 0.0 }
  0x9b   : > { %246 = vst [vmem:[%s759_s28 + $0x10] sm:$0xf] %v244_v14  ;;  %618 = vmatpush.msk.msra.mxu2 %vm199_vm0, %v244_v14  ;;  %620 = vmatpush.msk.msra.mxu3 %vm199_vm0, %v245_v15 }
  0x9c   : > { %247 = vst [vmem:[%s759_s28 + $0x18] sm:$0xf] %v245_v15  ;;  %619 = vmatmul.msk.f32.vlgmr.msra.gmra.mxu2 %vm196_vm1, %v250_v16  ;;  %621 = vmatmul.msk.f32.vlgmr.msra.gmra.mxu3 %vm196_vm1, %v250_v16 }
  0x9d   : > { %626 = vmatpush.msk.msrb.mxu2 %vm199_vm0, %v244_v14  ;;  %628 = vmatpush.msk.msrb.mxu3 %vm199_vm0, %v245_v15 }
  0x9e   : > { %v325_v20 = vpop.f32.mrf.mxu0  ;;  %v345_v21 = vpop.f32.mrf.mxu1 }
  0xa4   : > { %627 = vmatmul.msk.f32.vlgmr.msrb.gmra.mxu2 %vm196_vm1, %v366_v17  ;;  %629 = vmatmul.msk.f32.vlgmr.msrb.gmra.mxu3 %vm196_vm1, %v366_v17 }
  0xa6   : > { %v435_v36 = vpop.f32.mrf.mxu0  ;;  %v455_v37 = vpop.f32.mrf.mxu1 }
 0x11f   : > { %v276_v23 = vpop.f32.mrf.mxu2  ;;  %v296_v24 = vpop.f32.mrf.mxu3 }
 0x120   : > { %v326_v25 = vadd.f32 %v325_v20, %v276_v23  ;;  %v346_v26 = vadd.f32 %v345_v21, %v296_v24 }
 0x122   : > { %v352_v27 = vadd.f32 %v350_v22, %v326_v25  ;;  %v353_v28 = vadd.f32 %v350_v22, %v346_v26 }
 0x124   : > { %v354_v29 = vmax.f32 %v352_v27, 0.0  ;;  %v355_v30 = vmax.f32 %v353_v28, 0.0 }
 0x126   : > { %v358_v32 = vrot.slane %v354_v29, 4  ;;  %v359_v33 = vrot.slane %v355_v30, 4  ;;  %634 = vmatpush.msk.msra.mxu2 %vm199_vm0, %v354_v29  ;;  %636 = vmatpush.msk.msra.mxu3 %vm199_vm0, %v355_v30 }
 0x127   : > { %635 = vmatmul.msk.f32.vlgmr.msra.gmra.mxu2 %vm196_vm1, %v459_v31  ;;  %637 = vmatmul.msk.f32.vlgmr.msra.gmra.mxu3 %vm196_vm1, %v459_v31  ;;  %v386_v34 = vpop.f32.mrf.mxu2  ;;  %v406_v35 = vpop.f32.mrf.mxu3 }
 0x128   : > { %362 = vst [vmem:[%s759_s28] sm:$0xf0] %v358_v32  ;;  %v436_v38 = vadd.f32 %v435_v36, %v386_v34  ;;  %v456_v39 = vadd.f32 %v455_v37, %v406_v35 }
 0x129   : > { %363 = vst [vmem:[%s759_s28 + $0x8] sm:$0xf0] %v359_v33 }
 0x1aa   : > { %v483_v41 = vpop.f32.mrf.mxu2  ;;  %v503_v42 = vpop.f32.mrf.mxu3 }
 0x1ab   : > { %v506_v43 = vadd.f32 %v483_v41, %v436_v38  ;;  %v507_v44 = vadd.f32 %v503_v42, %v456_v39 }
 0x1ad   : > { %v512_v45 = vadd.f32 %v510_v40, %v506_v43  ;;  %v513_v46 = vadd.f32 %v510_v40, %v507_v44 }
 0x1af   : > { %v514_v47 = vmax.f32 %v512_v45, 0.0  ;;  %v515_v48 = vmax.f32 %v513_v46, 0.0 }
 0x1b1   : > { %516 = vst [vmem:[%s759_s28] sm:$0xf] %v514_v47 }
 0x1b2   : > { %517 = vst [vmem:[%s759_s28 + $0x8] sm:$0xf] %v515_v48 }
 0x1b3 PF: > { %s12_s11 = sadd.s32 1, %s694_s11   ;;  %s795_s9 = smov %s690_s10 }
 0x1b4   : > { %p9_p5 = scmp.ge.s32.totalorder %s12_s11, 4   ;;  %s796_s10 = smov %s798_s12 }
 0x1b6   :  { %11 = sbr.rel (!%p9_p5) target bundleno = 2 (0x2), region = 58 }

</bundles_post_ra>
